<compile_context>
chip_gen: v7x
topology: tpu7x:2x2x1
jax: 0.10.0
libtpu: 0.0.40
codegen_flags: <defaults>
</compile_context>

<pallas_src>
import math
import jax
import jax.numpy as jnp
from jax.experimental import pallas as pl
from jax.experimental.pallas import tpu as pltpu

STATE_SIZE = 4      # CartPole-v1 observation dim
ACTION_SIZE = 2     # CartPole-v1 action dim
HIDDEN = 128

_MAX_TILE = 2048         # cap on the per-grid-step batch tile
_NO_GRID_MAX_1TC = 4096  # v5e / v6e: one flat (no-grid) kernel up to this batch
_NO_GRID_MAX_2TC = 2048  # v7x: beyond this, use an even grid >= 2 for both TCs


def _round_up(x, m):
    return ((x + m - 1) // m) * m


def _tensorcores_per_chip():
    """Heuristic: v7x exposes 2 TensorCores that a 'parallel' grid axis can use."""
    try:
        kind = jax.devices()[0].device_kind.lower()
    except Exception:
        return 1
    return 2 if ("v7" in kind or "7x" in kind) else 1


def _dqn_kernel(x_ref, w1_ref, b1_ref, w2_ref, b2_ref, w3_ref, b3_ref, o_ref):
    """relu(x@W1+b1) -> relu(h@W2+b2) -> h@W3+b3 (bf16 matmuls, f32 accumulate)."""
    x = x_ref[...]                      # (tb, 4)  f32
    w1 = w1_ref[...]                    # (4, 128) f32

    # Layer 1: K=4 contraction on the VPU (broadcast multiply-accumulate);
    # a degenerate 4-deep MXU pass buys nothing while the kernel is
    # overhead-bound (per perf review).
    h1 = b1_ref[...]                    # (1, 128) -> broadcasts to (tb, 128)
    for k in range(STATE_SIZE):         # static unroll (4 iters)
        h1 = h1 + x[:, k:k + 1] * w1[k:k + 1, :]
    h1 = jnp.maximum(h1, 0.0)

    # Layer 2: 128x128 bf16 matmul on the MXU, f32 accumulation.
    h2 = jnp.dot(h1.astype(jnp.bfloat16), w2_ref[...],
                 preferred_element_type=jnp.float32) + b2_ref[...]
    h2 = jnp.maximum(h2, 0.0)

    # Output layer: 128x2 bf16 matmul, f32 accumulation.
    out = jnp.dot(h2.astype(jnp.bfloat16), w3_ref[...],
                  preferred_element_type=jnp.float32) + b3_ref[...]
    o_ref[...] = out.astype(o_ref.dtype)


def _cost_estimate(B, n_nets=1):
    flops = n_nets * 2 * B * (STATE_SIZE * HIDDEN
                              + HIDDEN * HIDDEN
                              + HIDDEN * ACTION_SIZE)
    weight_bytes = (
        STATE_SIZE * HIDDEN * 4 + HIDDEN * 4            # w1/b1 f32
        + HIDDEN * HIDDEN * 2 + HIDDEN * 4              # w2 bf16, b2 f32
        + HIDDEN * ACTION_SIZE * 2 + ACTION_SIZE * 4    # w3 bf16, b3 f32
    )
    bytes_accessed = (B * STATE_SIZE * 4
                      + n_nets * (B * ACTION_SIZE * 4 + weight_bytes))
    return pl.CostEstimate(flops=flops, transcendentals=0,
                           bytes_accessed=bytes_accessed)


def dqn_forward(x, params):
    """x: (B, STATE_SIZE) float32. Returns (B, ACTION_SIZE) float32."""
    w1, b1, w2, b2, w3, b3 = (
        params["w1"], params["b1"], params["w2"],
        params["b2"], params["w3"], params["b3"],
    )
    B = x.shape[0]
    args = (x, w1, b1, w2, b2, w3, b3)
    out_shape = jax.ShapeDtypeStruct((B, ACTION_SIZE), jnp.float32)
    cost = _cost_estimate(B)

    n_tc = _tensorcores_per_chip()
    no_grid_max = _NO_GRID_MAX_2TC if n_tc >= 2 else _NO_GRID_MAX_1TC

    if B <= no_grid_max:
        # Flat path: whole-array VMEM operands, no grid, no pipeline machinery.
        # On single-TC chips this covers everything up to a few thousand rows
        # (intermediates are ~2 MB of VMEM at B=4096 -- nowhere near budget).
        vmem = pl.BlockSpec(memory_space=pltpu.MemorySpace.VMEM)
        return pl.pallas_call(
            _dqn_kernel,
            out_shape=out_shape,
            in_specs=[vmem] * 7,
            out_specs=vmem,
            cost_estimate=cost,
        )(*args)

    # Gridded path: tile only the batch axis. Pick the tile so that
    #  * the tile is <= _MAX_TILE (VMEM is still trivial at 2048),
    #  * on v7x the grid count is a small EVEN number >= 2 so both
    #    TensorCores stay evenly loaded (grid=1 would serialize onto one TC).
    ngrid = max(n_tc, pl.cdiv(B, _MAX_TILE))
    if n_tc >= 2 and ngrid % 2:
        ngrid += 1
    tm = _round_up(pl.cdiv(B, ngrid), 8)
    grid = pl.cdiv(B, tm)

    # Weights never change block index -> single-buffer them (no wasted
    # double-buffer allocation / pipeline tracking for invariant operands).
    def resident(shape):
        return pl.BlockSpec(shape, lambda i: (0, 0),
                            pipeline_mode=pl.Buffered(buffer_count=1))

    return pl.pallas_call(
        _dqn_kernel,
        out_shape=out_shape,
        grid=(grid,),
        in_specs=[
            pl.BlockSpec((tm, STATE_SIZE), lambda i: (i, 0)),
            resident(w1.shape), resident(b1.shape),
            resident(w2.shape), resident(b2.shape),
            resident(w3.shape), resident(b3.shape),
        ],
        out_specs=pl.BlockSpec((tm, ACTION_SIZE), lambda i: (i, 0)),
        compiler_params=pltpu.CompilerParams(
            dimension_semantics=("parallel",)),
        cost_estimate=cost,
    )(*args)


def stack_params(params_list):
    """Stack N parameter dicts along a leading 'network' axis."""
    return {k: jnp.stack([p[k] for p in params_list]) for k in params_list[0]}


def dqn_forward_stacked(x, stacked_params):
    """Evaluate N stacked Q-networks (e.g. online + target) on the same batch
    in a single pallas_call.  Arrays in stacked_params carry a leading network
    axis: w1 (N,4,128), b1 (N,1,128), w2 (N,128,128) bf16, b2 (N,1,128),
    w3 (N,128,2) bf16, b3 (N,1,2).  Returns (N, B, ACTION_SIZE) float32.
    The network axis is a 'parallel' grid axis -> on v7x each net gets its own
    TensorCore; on all chips it halves the number of kernel launches."""
    w1, b1, w2, b2, w3, b3 = (
        stacked_params["w1"], stacked_params["b1"], stacked_params["w2"],
        stacked_params["b2"], stacked_params["w3"], stacked_params["b3"],
    )
    N = w1.shape[0]
    B = x.shape[0]
    cost = _cost_estimate(B, n_nets=N)

    def per_net(arr):
        # Leading network dim is squeezed out; kernel sees the 2-D weight/bias.
        return pl.BlockSpec((None,) + arr.shape[1:], lambda n: (n, 0, 0))

    # x is shared by every network -> index-invariant, single-buffered.
    shared_x = pl.BlockSpec(x.shape, lambda n: (0, 0),
                            pipeline_mode=pl.Buffered(buffer_count=1))

    return pl.pallas_call(
        _dqn_kernel,
        out_shape=jax.ShapeDtypeStruct((N, B, ACTION_SIZE), jnp.float32),
        grid=(N,),
        in_specs=[shared_x,
                  per_net(w1), per_net(b1),
                  per_net(w2), per_net(b2),
                  per_net(w3), per_net(b3)],
        out_specs=pl.BlockSpec((None, B, ACTION_SIZE), lambda n: (n, 0, 0)),
        compiler_params=pltpu.CompilerParams(
            dimension_semantics=("parallel",)),
        cost_estimate=cost,
    )(x, w1, b1, w2, b2, w3, b3)


def init_params(key):
    """nn.Linear-style init (uniform +-1/sqrt(fan_in)); weights as (in, out).
    w1/b1/b2/b3 kept in f32; w2/w3 stored in bf16 to halve the dominant DMA."""
    def linear(k, fan_in, fan_out):
        kw, kb = jax.random.split(k)
        bound = 1.0 / math.sqrt(fan_in)
        w = jax.random.uniform(kw, (fan_in, fan_out), jnp.float32, -bound, bound)
        b = jax.random.uniform(kb, (1, fan_out), jnp.float32, -bound, bound)
        return w, b

    k1, k2, k3 = jax.random.split(key, 3)
    w1, b1 = linear(k1, STATE_SIZE, HIDDEN)
    w2, b2 = linear(k2, HIDDEN, HIDDEN)
    w3, b3 = linear(k3, HIDDEN, ACTION_SIZE)
    return {
        "w1": w1, "b1": b1,
        "w2": w2.astype(jnp.bfloat16), "b2": b2,
        "w3": w3.astype(jnp.bfloat16), "b3": b3,
    }


def _reference(x, p):
    """Pure-JAX reference with matching mixed precision (bf16 matmul inputs,
    f32 accumulation), pinned to HIGHEST precision on the f32 matmuls."""
    hp = jax.lax.Precision.HIGHEST
    h1 = jnp.maximum(jnp.dot(x, p["w1"], precision=hp) + p["b1"], 0.0)
    h1b = h1.astype(jnp.bfloat16).astype(jnp.float32)
    h2 = jnp.maximum(
        jnp.dot(h1b, p["w2"].astype(jnp.float32), precision=hp) + p["b2"], 0.0)
    h2b = h2.astype(jnp.bfloat16).astype(jnp.float32)
    return jnp.dot(h2b, p["w3"].astype(jnp.float32), precision=hp) + p["b3"]


# TODO(synk): per-env-step (batch=1) callers should additionally use cross-call
# weight residency (P10: start the weight DMA in a prior pallas_call and return
# (semaphore, VMEM ref) futures) or fold several timesteps into one call so the
# ~35 KB of weights is not re-DMA'd every launch; that is a caller-side change.

if __name__ == "__main__":
    key = jax.random.PRNGKey(0)
    k_online, k_target, k_small, k_big = jax.random.split(key, 4)
    params = init_params(k_online)
    target_params = init_params(k_target)

    # 1) Small batch -> flat whole-array-VMEM path (no grid).
    x_small = jax.random.normal(k_small, (8, STATE_SIZE), jnp.float32)
    out_small = dqn_forward(x_small, params)
    jax.block_until_ready(out_small)
    assert out_small.shape == (8, ACTION_SIZE)
    assert jnp.allclose(out_small, _reference(x_small, params),
                        atol=1e-3, rtol=1e-3), "small-batch mismatch vs. reference"

    # 2) Large ragged batch -> gridded path (partial last tile is masked by Pallas).
    B_BIG = 4500
    x_big = jax.random.normal(k_big, (B_BIG, STATE_SIZE), jnp.float32)
    out_big = dqn_forward(x_big, params)
    jax.block_until_ready(out_big)
    assert out_big.shape == (B_BIG, ACTION_SIZE)
    assert jnp.allclose(out_big, _reference(x_big, params),
                        atol=1e-3, rtol=1e-3), "gridded-batch mismatch vs. reference"

    # 3) Online + target nets fused into ONE pallas_call ('parallel' network axis).
    stacked = stack_params([params, target_params])
    out_pair = dqn_forward_stacked(x_small, stacked)
    jax.block_until_ready(out_pair)
    assert out_pair.shape == (2, 8, ACTION_SIZE)
    assert jnp.allclose(out_pair[0], _reference(x_small, params),
                        atol=1e-3, rtol=1e-3), "stacked online-net mismatch"
    assert jnp.allclose(out_pair[1], _reference(x_small, target_params),
                        atol=1e-3, rtol=1e-3), "stacked target-net mismatch"

    print("KERNEL_OK")
</pallas_src>

<mosaic_0001>
module attributes {stable_mosaic.version = 11 : i64} {
  func.func @_dqn_kernel(%arg0: memref<8x4xf32, #tpu.memory_space<vmem>>, %arg1: memref<4x128xf32, #tpu.memory_space<vmem>>, %arg2: memref<1x128xf32, #tpu.memory_space<vmem>>, %arg3: memref<128x128xbf16, #tpu.memory_space<vmem>>, %arg4: memref<1x128xf32, #tpu.memory_space<vmem>>, %arg5: memref<128x2xbf16, #tpu.memory_space<vmem>>, %arg6: memref<1x2xf32, #tpu.memory_space<vmem>>, %arg7: memref<8x2xf32, #tpu.memory_space<vmem>>) attributes {dimension_semantics = [], scalar_prefetch = 0 : i64, scratch_operands = 0 : i64, tpu.core_type = #tpu.core_type<tc>} {
    %c0 = arith.constant 0 : index
    %c0_0 = arith.constant 0 : index
    %0 = vector.load %arg0[%c0, %c0_0] : memref<8x4xf32, #tpu.memory_space<vmem>>, vector<8x4xf32>
    %c0_1 = arith.constant 0 : index
    %c0_2 = arith.constant 0 : index
    %1 = vector.load %arg1[%c0_1, %c0_2] : memref<4x128xf32, #tpu.memory_space<vmem>>, vector<4x128xf32>
    %c0_3 = arith.constant 0 : index
    %c0_4 = arith.constant 0 : index
    %2 = vector.load %arg2[%c0_3, %c0_4] : memref<1x128xf32, #tpu.memory_space<vmem>>, vector<1x128xf32>
    %3 = vector.extract_strided_slice %0 {offsets = [0, 0], sizes = [8, 1], strides = [1, 1]} : vector<8x4xf32> to vector<8x1xf32>
    %4 = vector.extract_strided_slice %1 {offsets = [0, 0], sizes = [1, 128], strides = [1, 1]} : vector<4x128xf32> to vector<1x128xf32>
    %5 = vector.broadcast %3 : vector<8x1xf32> to vector<8x128xf32>
    %6 = vector.broadcast %4 : vector<1x128xf32> to vector<8x128xf32>
    %7 = arith.mulf %5, %6 : vector<8x128xf32>
    %8 = vector.broadcast %2 : vector<1x128xf32> to vector<8x128xf32>
    %9 = arith.addf %8, %7 : vector<8x128xf32>
    %10 = vector.extract_strided_slice %0 {offsets = [0, 1], sizes = [8, 1], strides = [1, 1]} : vector<8x4xf32> to vector<8x1xf32>
    %11 = vector.extract_strided_slice %1 {offsets = [1, 0], sizes = [1, 128], strides = [1, 1]} : vector<4x128xf32> to vector<1x128xf32>
    %12 = vector.broadcast %10 : vector<8x1xf32> to vector<8x128xf32>
    %13 = vector.broadcast %11 : vector<1x128xf32> to vector<8x128xf32>
    %14 = arith.mulf %12, %13 : vector<8x128xf32>
    %15 = arith.addf %9, %14 : vector<8x128xf32>
    %16 = vector.extract_strided_slice %0 {offsets = [0, 2], sizes = [8, 1], strides = [1, 1]} : vector<8x4xf32> to vector<8x1xf32>
    %17 = vector.extract_strided_slice %1 {offsets = [2, 0], sizes = [1, 128], strides = [1, 1]} : vector<4x128xf32> to vector<1x128xf32>
    %18 = vector.broadcast %16 : vector<8x1xf32> to vector<8x128xf32>
    %19 = vector.broadcast %17 : vector<1x128xf32> to vector<8x128xf32>
    %20 = arith.mulf %18, %19 : vector<8x128xf32>
    %21 = arith.addf %15, %20 : vector<8x128xf32>
    %22 = vector.extract_strided_slice %0 {offsets = [0, 3], sizes = [8, 1], strides = [1, 1]} : vector<8x4xf32> to vector<8x1xf32>
    %23 = vector.extract_strided_slice %1 {offsets = [3, 0], sizes = [1, 128], strides = [1, 1]} : vector<4x128xf32> to vector<1x128xf32>
    %24 = vector.broadcast %22 : vector<8x1xf32> to vector<8x128xf32>
    %25 = vector.broadcast %23 : vector<1x128xf32> to vector<8x128xf32>
    %26 = arith.mulf %24, %25 : vector<8x128xf32>
    %27 = arith.addf %21, %26 : vector<8x128xf32>
    %cst = arith.constant 0.000000e+00 : f32
    %28 = vector.broadcast %cst : f32 to vector<8x128xf32>
    %29 = arith.maximumf %27, %28 : vector<8x128xf32>
    %30 = arith.truncf %29 : vector<8x128xf32> to vector<8x128xbf16>
    %c0_5 = arith.constant 0 : index
    %c0_6 = arith.constant 0 : index
    %31 = vector.load %arg3[%c0_5, %c0_6] : memref<128x128xbf16, #tpu.memory_space<vmem>>, vector<128x128xbf16>
    %cst_7 = arith.constant dense<0.000000e+00> : vector<8x128xf32>
    %32 = tpu.matmul %30, %31, %cst_7 {dimension_numbers = #tpu.dot_dimension_numbers<[1], [0], [0], [1], [0, 0, 1, 1], [], []>} : vector<8x128xbf16>, vector<128x128xbf16>, vector<8x128xf32> -> vector<8x128xf32>
    %c0_8 = arith.constant 0 : index
    %c0_9 = arith.constant 0 : index
    %33 = vector.load %arg4[%c0_8, %c0_9] : memref<1x128xf32, #tpu.memory_space<vmem>>, vector<1x128xf32>
    %34 = vector.broadcast %33 : vector<1x128xf32> to vector<8x128xf32>
    %35 = arith.addf %32, %34 : vector<8x128xf32>
    %cst_10 = arith.constant 0.000000e+00 : f32
    %36 = vector.broadcast %cst_10 : f32 to vector<8x128xf32>
    %37 = arith.maximumf %35, %36 : vector<8x128xf32>
    %38 = arith.truncf %37 : vector<8x128xf32> to vector<8x128xbf16>
    %c0_11 = arith.constant 0 : index
    %c0_12 = arith.constant 0 : index
    %39 = vector.load %arg5[%c0_11, %c0_12] : memref<128x2xbf16, #tpu.memory_space<vmem>>, vector<128x2xbf16>
    %cst_13 = arith.constant dense<0.000000e+00> : vector<8x2xf32>
    %40 = tpu.matmul %38, %39, %cst_13 {dimension_numbers = #tpu.dot_dimension_numbers<[1], [0], [0], [1], [0, 0, 1, 1], [], []>} : vector<8x128xbf16>, vector<128x2xbf16>, vector<8x2xf32> -> vector<8x2xf32>
    %c0_14 = arith.constant 0 : index
    %c0_15 = arith.constant 0 : index
    %41 = vector.load %arg6[%c0_14, %c0_15] : memref<1x2xf32, #tpu.memory_space<vmem>>, vector<1x2xf32>
    %42 = vector.broadcast %41 : vector<1x2xf32> to vector<8x2xf32>
    %43 = arith.addf %40, %42 : vector<8x2xf32>
    %c0_16 = arith.constant 0 : index
    %c0_17 = arith.constant 0 : index
    %44 = vector.load %arg7[%c0_16, %c0_17] : memref<8x2xf32, #tpu.memory_space<vmem>>, vector<8x2xf32>
    tpu.vector_store %arg7[%c0_16, %c0_17], %43 {strides = array<i32>} : memref<8x2xf32, #tpu.memory_space<vmem>>, vector<8x2xf32>,
    return
  }
}

</mosaic_0001>

<bundles_post_ra>
// kernel: tpu_custom_call.1
= control target key start
LH: loop header
LB: loop body
LE: loop exit
PB: predicated region body
PF: predicated region fallthrough
CT: control target
= control target key end

     0   :  { %v413_v0 = vmov 0   ;;  %v414_v2 = vmov 2   ;;  %v415_v4 = vmov 0.0   ;;  %v416_v6 = vmov 1   ;;  %s543_s0 = inlined_call_operand.vmem [shape: f32[8,4], index: 0, kind: input, shape index: {}]   ;;  %s544_s3 = inlined_call_operand.vmem [shape: bf16[128,128], index: 3, kind: input, shape index: {}]   ;;  %s545_s5 = inlined_call_operand.vmem [shape: bf16[128,2], index: 5, kind: input, shape index: {}]   ;;  %s546_s1 = inlined_call_operand.vmem [shape: f32[4,128], index: 1, kind: input, shape index: {}]   ;;  %s547_s2 = inlined_call_operand.vmem [shape: f32[1,128], index: 2, kind: input, shape index: {}]   ;;  %s548_s4 = inlined_call_operand.vmem [shape: f32[1,128], index: 4, kind: input, shape index: {}]   ;;  %s549_s6 = inlined_call_operand.vmem [shape: f32[1,2], index: 6, kind: input, shape index: {}]   ;;  %s550_s7 = inlined_call_operand.vmem [shape: f32[8,2], index: 7, kind: output, shape index: {}]  }
   0x1   :  { %392 = vset.pattern.permute.xlu0 %v413_v0  ;;  %v27_v1 = vld [vmem:[%s543_s0] sm:$0xff]  ;;  %394 = vset.pattern.permute.xlu1 %v414_v2  ;;  %v398_v5 = vld [vmem:[%s544_s3 + $0x8] sm:$0xff]   ;;  %v417_v7 = vmov 3   ;;  %v399_v8 = vld [vmem:[%s544_s3 + $0x10] sm:$0xff]   ;;  %vm418_vm0 = vmmov 0   ;;  %v35_v20 = vlaneseq  ;;  %vm303_vm1 = vcmask 15360  }
   0x2   :  { %32 = vperm.xlu0 %392, %v27_v1   ;;  %58 = vperm.xlu1 %394, %v27_v1   ;;  %v397_v3 = vld [vmem:[%s544_s3] sm:$0xff]   ;;  %v400_v9 = vld [vmem:[%s544_s3 + $0x18] sm:$0xff]   ;;  %v402_v11 = vld [vmem:[%s544_s3 + $0x28] sm:$0xff]  }
   0x3   :  { %346 = vmatprep.subr.bf16.mxu0 %v415_v4  ;;  %366 = vmatprep.subr.bf16.mxu1 %v415_v4  ;;  %v401_v10 = vld [vmem:[%s544_s3 + $0x20] sm:$0xff]   ;;  %v406_v13 = vld [vmem:[%s545_s5 + $0x8] sm:$0xff]   ;;  %v403_v14 = vld [vmem:[%s544_s3 + $0x30] sm:$0xff]   ;;  %v36_v21 = vshrl.u32 %v35_v20, 7 }
   0x4   :  { %347 = vmatpush3.bf16.msra.mxu0 %v397_v3  ;;  %362 = vmatprep.mubr.msk.bf16.mxu0 %vm418_vm0, %v415_v4  ;;  %v405_v12 = vld [vmem:[%s545_s5] sm:$0xff]   ;;  %v407_v15 = vld [vmem:[%s545_s5 + $0x10] sm:$0xff]   ;;  %v404_v16 = vld [vmem:[%s544_s3 + $0x38] sm:$0xff]  }
   0x5   :  { %348 = vmatprep.subr.bf16.mxu0 %v415_v4  ;;  %382 = vmatprep.mubr.msk.bf16.mxu1 %vm418_vm0, %v415_v4  ;;  %v408_v17 = vld [vmem:[%s545_s5 + $0x18] sm:$0xff]   ;;  %v409_v18 = vld [vmem:[%s545_s5 + $0x20] sm:$0xff]   ;;  %v410_v19 = vld [vmem:[%s545_s5 + $0x28] sm:$0xff]   ;;  %v37_v22 = vsub.s32 0, %v36_v21  ;;  %v53_v25 = vsub.s32 1, %v36_v21  ;;  %v63_v27 = vsub.s32 2, %v36_v21 }
   0x6   :  { %393 = vset.pattern.permute.xlu0 %v416_v6  ;;  %395 = vset.pattern.permute.xlu1 %v417_v7  ;;  %v28_v23 = vld [vmem:[%s546_s1] sm:$0xf]  ;;  %v73_v29 = vsub.s32 3, %v36_v21  ;;  %v411_v46 = vld [vmem:[%s545_s5 + $0x30] sm:$0xff]   ;;  %v412_v47 = vld [vmem:[%s545_s5 + $0x38] sm:$0xff]  }
   0x7   :  { %48 = vperm.xlu0 %393, %v27_v1   ;;  %68 = vperm.xlu1 %395, %v27_v1   ;;  %v38_v24 = vrot.slane %v28_v23, %v37_v22  ;;  %v54_v31 = vrot.slane %v28_v23, %v53_v25  ;;  %v309_v32 = vld [vmem:[%s547_s2] ss:$0 sm:$0xff]  ;;  %v64_v33 = vrot.slane %v28_v23, %v63_v27 }
   0x8   :  { %349 = vmatpush3.bf16.msra.mxu0 %v398_v5  ;;  %367 = vmatpush3.bf16.msra.mxu1 %v405_v12  ;;  %v74_v34 = vrot.slane %v28_v23, %v73_v29  ;;  %v310_v48 = vld [vmem:[%s548_s4] ss:$0 sm:$0xff] }
   0x9   :  { %350 = vmatprep.subr.bf16.mxu0 %v415_v4  ;;  %368 = vmatprep.subr.bf16.mxu1 %v415_v4  ;;  %v319_v56 = vld [vmem:[%s549_s6] ss:$0 sm:$0xff] }
   0xb   :  { %396 = vset.pattern.permute.xlu0 %v417_v7 }
   0xc   :  { %351 = vmatpush3.bf16.msra.mxu0 %v399_v8  ;;  %369 = vmatpush3.bf16.msra.mxu1 %v406_v13 }
   0xd   :  { %352 = vmatprep.subr.bf16.mxu0 %v415_v4  ;;  %370 = vmatprep.subr.bf16.mxu1 %v415_v4 }
  0x10   :  { %353 = vmatpush3.bf16.msra.mxu0 %v400_v9  ;;  %371 = vmatpush3.bf16.msra.mxu1 %v407_v15 }
  0x11   :  { %354 = vmatprep.subr.bf16.mxu0 %v415_v4  ;;  %372 = vmatprep.subr.bf16.mxu1 %v415_v4 }
  0x14   :  { %355 = vmatpush3.bf16.msra.mxu0 %v401_v10  ;;  %373 = vmatpush3.bf16.msra.mxu1 %v408_v17 }
  0x15   :  { %356 = vmatprep.subr.bf16.mxu0 %v415_v4  ;;  %374 = vmatprep.subr.bf16.mxu1 %v415_v4 }
  0x18   :  { %357 = vmatpush3.bf16.msra.mxu0 %v402_v11  ;;  %375 = vmatpush3.bf16.msra.mxu1 %v409_v18 }
  0x19   :  { %358 = vmatprep.subr.bf16.mxu0 %v415_v4  ;;  %376 = vmatprep.subr.bf16.mxu1 %v415_v4 }
  0x1c   :  { %359 = vmatpush3.bf16.msra.mxu0 %v403_v14  ;;  %377 = vmatpush3.bf16.msra.mxu1 %v410_v19 }
  0x1d   :  { %360 = vmatprep.subr.bf16.mxu0 %v415_v4  ;;  %378 = vmatprep.subr.bf16.mxu1 %v415_v4 }
  0x20   :  { %361 = vmatpush3.bf16.msra.mxu0 %v404_v16  ;;  %379 = vmatpush3.bf16.msra.mxu1 %v411_v46 }
  0x21   :  { %380 = vmatprep.subr.bf16.mxu1 %v415_v4 }
  0x24   :  { %381 = vmatpush3.bf16.msra.mxu1 %v412_v47 }
  0x81   :  { %v33_v26 = vpop.permute.xlu0 %32  ;;  %v59_v28 = vpop.permute.xlu1 %58 }
  0x82   :  { %v39_v30 = vmul.f32 %v38_v24, %v33_v26  ;;  %v65_v39 = vmul.f32 %v64_v33, %v59_v28 }
  0x84   :  { %v46_v37 = vadd.f32 %v309_v32, %v39_v30 }
  0x86   :  { %v49_v35 = vpop.permute.xlu0 %48  ;;  %v69_v36 = vpop.permute.xlu1 %68 }
  0x87   :  { %v55_v38 = vmul.f32 %v54_v31, %v49_v35  ;;  %v75_v41 = vmul.f32 %v74_v34, %v69_v36 }
  0x89   :  { %v56_v40 = vadd.f32 %v55_v38, %v46_v37 }
  0x8b   :  { %v66_v42 = vadd.f32 %v65_v39, %v56_v40 }
  0x8d   :  { %v76_v43 = vadd.f32 %v75_v41, %v66_v42 }
  0x8f   :  { %v77_v44 = vmax.f32 %v76_v43, 0.0 }
  0x91   :  { %v78_v45 = vpack.c.bf16 %v77_v44, %v77_v44 }
  0x93   :  { %363 = vmatmul.mubr.bf16.vlgmr.msra.gmra.mrb[0].mxu0 %v78_v45 }
 0x166   :  { %v184_v49 = vpop.f32.mrb[0].mxu0 }
 0x167   :  { %v185_v50 = vadd.f32 %v310_v48, %v184_v49  ;;  %v364_v51 = vpop.f32.mrb[1].mxu0 }
 0x168   :  { %v187_v52 = vpop.f32.mrb[2].mxu0 }
 0x169   :  { %v190_v53 = vmax.f32 %v185_v50, 0.0  ;;  %v365_v54 = vpop.f32.mrb[3].mxu0 }
 0x16b   :  { %v191_v55 = vpack.c.bf16 %v190_v53, %v190_v53 }
 0x16d   :  { %383 = vmatmul.mubr.bf16.vlgmr.msra.gmra.mrb[0].mxu1 %v191_v55 }
 0x240   :  { %v297_v57 = vpop.f32.mrb[0].mxu1 }
 0x241   :  { %v298_v58 = vadd.f32 %v319_v56, %v297_v57  ;;  %v384_v59 = vpop.f32.mrb[1].mxu1 }
 0x242   :  { %v300_v60 = vpop.f32.mrb[2].mxu1 }
 0x243   :  { %304 = vst.msk [vmem:[%s550_s7] sm:$0xff] %vm303_vm1, %v298_v58  ;;  %v385_v61 = vpop.f32.mrb[3].mxu1 }

</bundles_post_ra>
